<compile_context>
chip_gen: v5e
topology: v5e:2x2
jax: 0.10.0
libtpu: 0.0.40
codegen_flags: <defaults>
</compile_context>

<pallas_src>
import jax
import jax.numpy as jnp
from jax.experimental import pallas as pl
from jax.experimental.pallas import tpu as pltpu


# ------------------------- fast path: per-segment grid ----------------------
def _make_segment_kernel(range_shifts, seq, feats, use_mask):
    """One grid step == one (batch, segment) pair; segment lane block is dense.

    range_shifts: static shifts of the segments inside the processed lane
    range (may contain zeros for segments sandwiched between shifted ones).
    """
    def kernel(*refs):
        if use_mask:
            x_ref, mask_ref, o_ref = refs
        else:
            x_ref, o_ref = refs

        j = pl.program_id(1)                 # which segment of the range
        x = x_ref[0]                         # (seq, feats)
        if use_mask:
            # {0,1} mask in x.dtype, broadcast hoisted ONCE (no per-branch
            # re-broadcast; JAX does not CSE broadcast_in_dim).
            m_b = jnp.broadcast_to(mask_ref[0], (seq, feats))

        for k, amt in enumerate(range_shifts):
            @pl.when(j == k)
            def _(amt=amt):
                if amt == 0:
                    # zero-shift segment inside the range: straight copy
                    o_ref[0] = x
                else:
                    xm = x * m_b if use_mask else x   # mask BEFORE shifting
                    if amt > 0:
                        # out[i] = in[i - amt] for i >= amt, else 0
                        o_ref[0, :amt, :] = jnp.zeros((amt, feats), x.dtype)
                        o_ref[0, amt:, :] = xm[:seq - amt, :]
                    else:
                        a = -amt
                        # out[i] = in[i + a] for i < seq - a, else 0
                        o_ref[0, :seq - a, :] = xm[a:, :]
                        o_ref[0, seq - a:, :] = jnp.zeros((a, feats), x.dtype)

    return kernel


# ------------------ fallback: lane-misaligned feats_per_shift ---------------
def _make_fullslab_kernel(shifts, feats, seq, dim, use_mask):
    """Full (seq, dim) slab per batch element; single full-width lane-dense
    store (per the review: when feats % 128 != 0, per-segment stores would be
    masked vst + lane selects, so keep the concat+one-store path)."""
    segments = len(shifts)

    def kernel(*refs):
        if use_mask:
            x_ref, mask_ref, o_ref = refs
        else:
            x_ref, o_ref = refs
        x = x_ref[0]                                          # (seq, dim)
        if use_mask:
            m_b = jnp.broadcast_to(mask_ref[0], (seq, feats))  # hoisted once

        pieces = []
        for s, amt in enumerate(shifts):
            lo = s * feats
            seg = x[:, lo:lo + feats]
            if amt != 0:
                if use_mask:
                    seg = seg * m_b
                if amt > 0:
                    pad = jnp.zeros((amt, feats), x.dtype)
                    seg = jnp.concatenate([pad, seg[:seq - amt, :]], axis=0)
                else:
                    a = -amt
                    pad = jnp.zeros((a, feats), x.dtype)
                    seg = jnp.concatenate([seg[a:, :], pad], axis=0)
            pieces.append(seg)

        rest_lo = segments * feats
        if rest_lo < dim:
            pieces.append(x[:, rest_lo:])                     # pass-through tail

        o_ref[0] = pieces[0] if len(pieces) == 1 else jnp.concatenate(pieces, -1)

    return kernel


# --------------------------------- wrapper -----------------------------------
def pre_shift_tokens(x, shifts, mask=None, fn=None, **kwargs):
    """Pallas implementation of PreShiftTokens.forward.

    x:      (batch, seq, dim)
    shifts: tuple of static ints
    mask:   optional (batch, seq) boolean (zeroes tokens before shifting,
            only for nonzero-shift segments)
    fn:     optional callable applied to the shifted tensor (identity if None).
    """
    batch, seq, dim = x.shape
    shifts = tuple(int(s) for s in shifts)
    segments = len(shifts)
    assert segments >= 1 and dim // segments >= 1
    feats = dim // segments
    assert all(abs(a) < seq for a in shifts), "shift amount must be < seq_len"

    use_mask = mask is not None
    if use_mask:
        mask_f = mask.astype(x.dtype).reshape(batch, seq, 1)   # {0,1} in x.dtype

    shifted_ids = [i for i, a in enumerate(shifts) if a != 0]

    if not shifted_ids:
        # All shifts are zero: the module is a pure pass-through.
        out = x

    elif feats % 128 == 0:
        # --------- fast path: only move the shifted lane range -------------
        lo_seg = min(shifted_ids)
        hi_seg = max(shifted_ids) + 1
        range_shifts = shifts[lo_seg:hi_seg]
        n = len(range_shifts)

        kernel = _make_segment_kernel(range_shifts, seq, feats, use_mask)

        in_specs = [pl.BlockSpec((1, seq, feats),
                                 lambda b, j: (b, 0, lo_seg + j))]
        args = [x]
        if use_mask:
            in_specs.append(pl.BlockSpec((1, seq, 1), lambda b, j: (b, 0, 0)))
            args.append(mask_f)

        itemsize = x.dtype.itemsize
        blk = seq * feats * itemsize                       # one (seq, feats) block
        need = 4 * blk + (2 * seq * 128 * itemsize if use_mask else 0) + (1 << 20)
        vmem_limit = int(min(max(need, 16 << 20), 48 << 20))  # <= v7x headroom

        out = pl.pallas_call(
            kernel,
            out_shape=jax.ShapeDtypeStruct((batch, seq, dim), x.dtype),
            grid=(batch, n),
            in_specs=in_specs,
            out_specs=pl.BlockSpec((1, seq, feats),
                                   lambda b, j: (b, 0, lo_seg + j)),
            # x aliased to the output: lanes never visited by the out_spec
            # (zero-shift leading segments, feature tail) pass through with
            # zero HBM traffic.  Per-step in/out block ranges coincide, so the
            # in-place update is hazard-free.
            input_output_aliases={0: 0},
            compiler_params=pltpu.CompilerParams(
                dimension_semantics=("parallel", "parallel"),
                vmem_limit_bytes=vmem_limit),
        )(*args)

    else:
        # --------- fallback: lane-misaligned segment width ------------------
        kernel = _make_fullslab_kernel(shifts, feats, seq, dim, use_mask)
        in_specs = [pl.BlockSpec((1, seq, dim), lambda b: (b, 0, 0))]
        args = [x]
        if use_mask:
            in_specs.append(pl.BlockSpec((1, seq, 1), lambda b: (b, 0, 0)))
            args.append(mask_f)

        out = pl.pallas_call(
            kernel,
            out_shape=jax.ShapeDtypeStruct((batch, seq, dim), x.dtype),
            grid=(batch,),
            in_specs=in_specs,
            out_specs=pl.BlockSpec((1, seq, dim), lambda b: (b, 0, 0)),
            compiler_params=pltpu.CompilerParams(
                dimension_semantics=("parallel",)),
        )(*args)

    if fn is not None:
        # TODO(synk): self.fn is an arbitrary wrapped module (attention/FF);
        # it is applied as plain JAX outside the kernel.
        if mask is not None:
            kwargs = dict(kwargs, mask=mask)
        out = fn(out, **kwargs)
    return out


# ---------------- pure-JAX reference (mirrors the PyTorch module) -----------
def _ref_shift(t, amount, mask=None):
    if amount == 0:
        return t
    if mask is not None:
        t = jnp.where(mask[..., None], t, 0.0)
    b, s, f = t.shape
    if amount > 0:
        return jnp.concatenate(
            [jnp.zeros((b, amount, f), t.dtype), t[:, :s - amount]], axis=1)
    a = -amount
    return jnp.concatenate(
        [t[:, a:], jnp.zeros((b, a, f), t.dtype)], axis=1)


def _ref_pre_shift_tokens(x, shifts, mask=None):
    segments = len(shifts)
    fps = x.shape[-1] // segments
    n = -(-x.shape[-1] // fps)
    chunks = [x[..., i * fps:min((i + 1) * fps, x.shape[-1])] for i in range(n)]
    shifted = [_ref_shift(t, a, mask) for t, a in zip(chunks[:segments], shifts)]
    return jnp.concatenate(shifted + chunks[segments:], axis=-1)


if __name__ == "__main__":
    # Small shapes consistent with the module; dim = 3*128 keeps every segment
    # block lane-dense so the fast (aliased, traffic-cut) path is exercised,
    # including the zero-traffic pass-through of the shift-0 segment.
    batch, seq, dim = 2, 8, 384
    shifts = (0, 1, -1)

    key = jax.random.PRNGKey(0)
    k_x, _ = jax.random.split(key)
    x = jax.random.normal(k_x, (batch, seq, dim), dtype=jnp.float32)

    # Boolean padding mask: batch 0 fully valid, batch 1 valid for 5 tokens.
    lengths = jnp.array([seq, 5])
    mask = jnp.arange(seq)[None, :] < lengths[:, None]

    identity_fn = lambda t, **kw: t

    ref_m = _ref_pre_shift_tokens(x, shifts, mask=mask)
    ref_nm = _ref_pre_shift_tokens(x, shifts, mask=None)

    out_m = jax.block_until_ready(
        pre_shift_tokens(x, shifts, mask=mask, fn=identity_fn))
    out_nm = jax.block_until_ready(pre_shift_tokens(x, shifts, mask=None))

    assert out_m.shape == (batch, seq, dim), out_m.shape
    assert jnp.allclose(out_m, ref_m), "mismatch vs reference (masked)"
    assert jnp.allclose(out_nm, ref_nm), "mismatch vs reference (no mask)"

    print("KERNEL_OK")
</pallas_src>

<mosaic_0001>
module attributes {stable_mosaic.version = 11 : i64} {
  func.func @kernel(%arg0: i32, %arg1: i32, %arg2: memref<1x8x128xf32, #tpu.memory_space<vmem>>, %arg3: memref<1x8x1xf32, #tpu.memory_space<vmem>>, %arg4: memref<1x8x128xf32, #tpu.memory_space<vmem>>) attributes {dimension_semantics = [#tpu.dimension_semantics<parallel>, #tpu.dimension_semantics<parallel>], iteration_bounds = array<i64: 2, 2>, scalar_prefetch = 0 : i64, scratch_operands = 0 : i64, tpu.core_type = #tpu.core_type<tc>, window_params = [{transform_indices = @transform_0, window_bounds = array<i64: 1, 8, 128>}, {transform_indices = @transform_1, window_bounds = array<i64: 1, 8, 1>}, {transform_indices = @transform_2, window_bounds = array<i64: 1, 8, 128>}]} {
    %c0 = arith.constant 0 : index
    %c0_0 = arith.constant 0 : index
    %c0_1 = arith.constant 0 : index
    %0 = vector.load %arg2[%c0, %c0_0, %c0_1] : memref<1x8x128xf32, #tpu.memory_space<vmem>>, vector<1x8x128xf32>
    %1 = vector.shape_cast %0 : vector<1x8x128xf32> to vector<8x128xf32>
    %c0_2 = arith.constant 0 : index
    %c0_3 = arith.constant 0 : index
    %c0_4 = arith.constant 0 : index
    %2 = vector.load %arg3[%c0_2, %c0_3, %c0_4] : memref<1x8x1xf32, #tpu.memory_space<vmem>>, vector<1x8x1xf32>
    %3 = vector.shape_cast %2 : vector<1x8x1xf32> to vector<8x1xf32>
    %4 = vector.shape_cast %3 : vector<8x1xf32> to vector<8x1xf32>
    %5 = vector.broadcast %4 : vector<8x1xf32> to vector<8x128xf32>
    %c0_i32 = arith.constant 0 : i32
    %6 = arith.cmpi eq, %arg1, %c0_i32 : i32
    %7 = arith.extui %6 : i1 to i32
    %c0_i32_5 = arith.constant 0 : i32
    %8 = arith.cmpi ne, %7, %c0_i32_5 : i32
    scf.if %8 {
      %12 = arith.mulf %1, %5 : vector<8x128xf32>
      %cst = arith.constant 0.000000e+00 : f32
      %13 = vector.broadcast %cst : f32 to vector<1x128xf32>
      %c0_7 = arith.constant 0 : index
      %c0_8 = arith.constant 0 : index
      %c0_9 = arith.constant 0 : index
      %14 = vector.load %arg4[%c0_7, %c0_8, %c0_9] : memref<1x8x128xf32, #tpu.memory_space<vmem>>, vector<1x1x128xf32>
      %15 = vector.shape_cast %14 : vector<1x1x128xf32> to vector<1x128xf32>
      %16 = vector.shape_cast %13 : vector<1x128xf32> to vector<1x1x128xf32>
      tpu.vector_store %arg4[%c0_7, %c0_8, %c0_9], %16 {strides = array<i32>} : memref<1x8x128xf32, #tpu.memory_space<vmem>>, vector<1x1x128xf32>,
      %17 = vector.extract_strided_slice %12 {offsets = [0, 0], sizes = [7, 128], strides = [1, 1]} : vector<8x128xf32> to vector<7x128xf32>
      %c0_10 = arith.constant 0 : index
      %c1 = arith.constant 1 : index
      %c0_11 = arith.constant 0 : index
      %18 = vector.load %arg4[%c0_10, %c1, %c0_11] : memref<1x8x128xf32, #tpu.memory_space<vmem>>, vector<1x7x128xf32>
      %19 = vector.shape_cast %18 : vector<1x7x128xf32> to vector<7x128xf32>
      %20 = vector.shape_cast %17 : vector<7x128xf32> to vector<1x7x128xf32>
      tpu.vector_store %arg4[%c0_10, %c1, %c0_11], %20 {strides = array<i32>} : memref<1x8x128xf32, #tpu.memory_space<vmem>>, vector<1x7x128xf32>,
    } else {
    }
    %c1_i32 = arith.constant 1 : i32
    %9 = arith.cmpi eq, %arg1, %c1_i32 : i32
    %10 = arith.extui %9 : i1 to i32
    %c0_i32_6 = arith.constant 0 : i32
    %11 = arith.cmpi ne, %10, %c0_i32_6 : i32
    scf.if %11 {
      %12 = arith.mulf %1, %5 : vector<8x128xf32>
      %13 = vector.extract_strided_slice %12 {offsets = [1, 0], sizes = [7, 128], strides = [1, 1]} : vector<8x128xf32> to vector<7x128xf32>
      %c0_7 = arith.constant 0 : index
      %c0_8 = arith.constant 0 : index
      %c0_9 = arith.constant 0 : index
      %14 = vector.load %arg4[%c0_7, %c0_8, %c0_9] : memref<1x8x128xf32, #tpu.memory_space<vmem>>, vector<1x7x128xf32>
      %15 = vector.shape_cast %14 : vector<1x7x128xf32> to vector<7x128xf32>
      %16 = vector.shape_cast %13 : vector<7x128xf32> to vector<1x7x128xf32>
      tpu.vector_store %arg4[%c0_7, %c0_8, %c0_9], %16 {strides = array<i32>} : memref<1x8x128xf32, #tpu.memory_space<vmem>>, vector<1x7x128xf32>,
      %cst = arith.constant 0.000000e+00 : f32
      %17 = vector.broadcast %cst : f32 to vector<1x128xf32>
      %c0_10 = arith.constant 0 : index
      %c7 = arith.constant 7 : index
      %c0_11 = arith.constant 0 : index
      %18 = vector.load %arg4[%c0_10, %c7, %c0_11] : memref<1x8x128xf32, #tpu.memory_space<vmem>>, vector<1x1x128xf32>
      %19 = vector.shape_cast %18 : vector<1x1x128xf32> to vector<1x128xf32>
      %20 = vector.shape_cast %17 : vector<1x128xf32> to vector<1x1x128xf32>
      tpu.vector_store %arg4[%c0_10, %c7, %c0_11], %20 {strides = array<i32>} : memref<1x8x128xf32, #tpu.memory_space<vmem>>, vector<1x1x128xf32>,
    } else {
    }
    return
  }
  func.func @transform_0(%arg0: i32, %arg1: i32) -> (i32, i32, i32) {
    %c1_i32 = arith.constant 1 : i32
    %0 = arith.addi %c1_i32, %arg1 : i32
    %c0_i32 = arith.constant 0 : i32
    %c0_i32_0 = arith.constant 0 : i32
    return %arg0, %c0_i32, %0 : i32, i32, i32
  }
  func.func @transform_1(%arg0: i32, %arg1: i32) -> (i32, i32, i32) {
    %c0_i32 = arith.constant 0 : i32
    %c0_i32_0 = arith.constant 0 : i32
    %c0_i32_1 = arith.constant 0 : i32
    return %arg0, %c0_i32, %c0_i32_0 : i32, i32, i32
  }
  func.func @transform_2(%arg0: i32, %arg1: i32) -> (i32, i32, i32) {
    %c1_i32 = arith.constant 1 : i32
    %0 = arith.addi %c1_i32, %arg1 : i32
    %c0_i32 = arith.constant 0 : i32
    %c0_i32_0 = arith.constant 0 : i32
    return %arg0, %c0_i32, %0 : i32, i32, i32
  }
}

</mosaic_0001>

<bundles_post_ra>
// kernel: tpu_custom_call.1
= control target key start
LH: loop header
LB: loop body
LE: loop exit
PB: predicated region body
PF: predicated region fallthrough
CT: control target
= control target key end

     0   :  { %7 = vsyncpa [#allocation3], 0  ;;  %s742_s0 = inlined_call_operand.hbm [shape: f32[2,8,384], index: 0, kind: input, shape index: {}, may-alias: {0,2}]   ;;  %s743_s1 = inlined_call_operand.vmem [shape: f32[2,8,1], index: 1, kind: input, shape index: {}]   ;;  %s744_s2 = inlined_call_operand.hbm [shape: f32[2,8,384], index: 2, kind: output, shape index: {}, may-alias: {0,2}]  }
   0x1   :  { %9 = vsyncpa [#allocation3 + $0x1], 0 }
   0x2   :  { %10 = vsyncpa [#allocation4], 0 }
   0x3   :  { %12 = vsyncpa [#allocation4 + $0x1], 0  ;;  %s588_s9 = smov 0   ;;  %s590_s10 = smov 0  }
   0x4   :  { %s592_s11 = smov 0   ;;  %s594_s12 = smov 0  }
   0x5   :  { %s596_s13 = smov 0   ;;  %s598_s14 = smov 0  }
   0x6   :  { %s600_s15 = smov 0   ;;  %s602_s16 = smov 0  }
   0x7 LB: > { %s342_s17 = sadd.s32 4294967295, %s568_s16   ;;  %s343_s18 = sadd.s32 4294967294, %s568_s16   ;;  %s568_s16 = sphi %s602_s16, %s18_s16   ;;  %s564_s15 = sphi %s600_s15, %s755_s15   ;;  %s560_s14 = sphi %s598_s14, %s754_s14   ;;  %s556_s13 = sphi %s596_s13, %s753_s13   ;;  %s552_s12 = sphi %s594_s12, %s752_s12   ;;  %s548_s11 = sphi %s592_s11, %s751_s11   ;;  %s544_s10 = sphi %s590_s10, %s750_s10   ;;  %s540_s9 = sphi %s588_s9, %s749_s9  }
   0x8   : > { %s27_s19 = sadd.s32 1, %s560_s14  ;;  %s30_s20 = sadd.s32 1, %s564_s15 }
   0x9   : > { %p28_p0 = scmp.ge.s32.totalorder %s27_s19, 2  ;;  %s41_s21 = sadd.s32 1, %s548_s11 }
   0xa   : > { %p48_p1 = scmp.ne.s32.totalorder %s548_s11, %s544_s10  ;;  %p49_p2 = scmp.eq.s32.totalorder %s568_s16, 0 }
   0xb   : > { %s636_s22 = scalar_select %p28_p0, 0, %s27_s19  }
   0xc   : > { %s757_s20 = smov (!%p28_p0, %s30_s20), %s564_s15  ;;  %p643_p3 = por %p49_p2, %p48_p1 }
   0xd   : > { %s35_s23 = sadd.s32 1, %s636_s22  ;;  %p32_p4 = scmp.ge.s32.totalorder %s757_s20, 2 }
   0xe   : > { %s37_s25 = ssub.s32 %s27_s19, %s35_s23  ;;  %p54_p5 = scmp.ne.s32.totalorder %s544_s10, %s540_s9 }
   0xf   : > { %p55_p6 = scmp.eq.s32.totalorder %s342_s17, 0  ;;  %s759_s20 = smov (%p32_p4, %s757_s20), 0 }
  0x10   : > { %p108_p8 = scmp.eq.s32.totalorder %s342_s17, 3  ;;  %s36_s27 = ssub.s32 %s564_s15, %s759_s20 }
  0x11   : > { %p651_p7 = por %p55_p6, %p54_p5  ;;  %p114_p9 = scmp.eq.s32.totalorder %s343_s18, 3 }
  0x12   : > { %s38_s28 = sor.u32 %s37_s25, %s36_s27  ;;  %p660_p10 = por %p108_p8, %p48_p1 }
  0x13   : > { %p39_p11 = scmp.eq.s32.totalorder %s38_s28, 0  ;;  %p664_p12 = por %p114_p9, %p54_p5 }
  0x14   : > { %p370_p13 = scmp.lt.s32.totalorder %s568_s16, 4  ;;  %s134_s4 = sand.u32 1, %s548_s11  }
  0x15   : > { %s670_s3 = scalar_select %p39_p11, %s548_s11, %s41_s21  }
  0x16   : > { %s270_s5 = smul.u32 3, %s564_s15  ;;  %s346_s6 = sshll.u32 %s134_s4, 3 }
  0x17   : > { %s138_s17 = scalar_lea.vmem [#allocation2], %s346_s6  ;;  %p363_p0 = pnand %p370_p13, %p643_p3 }
  0x18   : > { %s271_s7 = sadd.s32 %s560_s14, %s270_s5  ;;  %s149_s18 = sshll.u32 %s138_s17, 4  ;;  %s150_s18 = int_to_ptr.vmem [resolvable:$true] %s149_s18 }
  0x19   : > { %s347_s8 = sshll.u32 %s271_s7, 3  ;;  %p348_p1 = scmp.ge.s32.totalorder %s568_s16, 1 }
  0x1a   : > { %s273_s25 = scalar_lea.hbm %s742_s0, %s347_s8  ;;  %s135_s21 = scalar_lea.sflag [#allocation3], %s134_s4 }
  0x1b   : > { %s274_s27 = scalar_lea.hbm %s273_s25, 8  ;;  %p161_p2 = scmp.lt.s32.totalorder %s568_s16, 5 }
  0x1c   : > { %s147_s28 = sshll.u32 %s274_s27, 4  ;;  %s148_s28 = int_to_ptr.hbm [resolvable:$true] %s147_s28 }
  0x1d   : > { %365 = dma.hbm_to_vmem [thread:$0]  (!%p363_p0), %s148_s28, 128, %s150_s18, %s135_s21  }
  0x1e   : > { %p162_p4 = pnand %p348_p1, %p161_p2 }
  0x1f   : > { %s683_s5 = sand.u32 (!%p162_p4), 1, %s544_s10  }
  0x20   : > { %165 = sbr.rel (%p162_p4) target bundleno = 192 (0xc0), region = 28  ;;  %s349_s6 = sshll.u32 (!%p162_p4), %s683_s5, 3 }
  0x21   : > { %s168_s7 = scalar_lea.sflag (!%p162_p4), [#allocation3], %s683_s5  ;;  %s171_s8 = scalar_lea.vmem (!%p162_p4), [#allocation2], %s349_s6 }
  0x25   : > { %531 = dma.done.wait (%p651_p7), %s168_s7, 128  }
  0x26   : > { %533 = vsyncadd (%p651_p7), %s168_s7, 4294967168  ;;  %p198_p3 = scmp.lt.s32.totalorder %s556_s13, 1  ;;  %v570_v0 = vmov 0   ;;  %v203_v1 = vld [vmem:[%s171_s8] sm:$0xff]  ;;  %s196_s23 = scalar_lea.vmem [#allocation5], %s349_s6 }
  0x27   : > { %439 = vset.pattern.permute.xlu0 %v570_v0  ;;  %p352_p5 = scmp.ne.s32.totalorder %s552_s12, 0 }
  0x28   : > { %s199_s24 = scalar_select %p198_p3, %s556_s13, 1 }
  0x2a   : > { %s351_s4 = sshll.u32 %s199_s24, 3 }
  0x2b   : > { %s201_s19 = scalar_lea.vmem %s743_s1, %s351_s4 }
  0x2c   : > { %v204_v2 = vld [vmem:[%s201_s19] sm:$0xff] }
  0x2d   : > { %207 = vperm.xlu0 %439, %v204_v2  }
  0x9b   : > { %213 = sbr.rel (%p352_p5) target bundleno = 163 (0xa3), region = 36 }
  0x9f   : > { %v208_v3 = vpop.permute.xlu0 %207 }
  0xa0   : > { %v214_v4 = vmul.f32 %v208_v3, %v203_v1  ;;  %v571_v5 = vmov 0.0  }
  0xa1   : > { %215 = vst [vmem:[%s196_s23] sm:$0x1] %v571_v5 }
  0xa2   : > { %216 = vst [vmem:[%s196_s23 + $0x1] sm:$0x7f] %v214_v4 }
  0xa3 PF: > { %p353_p6 = scmp.ne.s32.totalorder %s552_s12, 1 }
  0xa5   : > { %220 = sbr.rel (%p353_p6) target bundleno = 173 (0xad), region = 40 }
  0xaa   : > { %v221_v6 = vmul.f32 %v208_v3, %v203_v1  ;;  %v572_v7 = vmov 0.0  }
  0xab   : > { %223 = vst [vmem:[%s196_s23 + $0x7] sm:$0x1] %v572_v7 }
  0xac   : > { %222 = vst [vmem:[%s196_s23 - $0x1] sm:$0xfe] %v221_v6 }
  0xad PF: > { %s293_s26 = smul.u32 3, %s556_s13  ;;  %s240_s27 = sshll.u32 %s196_s23, 4  ;;  %s241_s27 = int_to_ptr.vmem [resolvable:$true] %s240_s27 }
  0xae   : > { %s225_s4 = scalar_lea.sflag [#allocation4], %s683_s5  ;;  %s490_s19 = scalar_lea.hbm %s744_s2, 48 }
  0xaf   : > { %s294_s25 = sadd.s32 %s552_s12, %s293_s26 }
  0xb0   : > { %s355_s28 = sshll.u32 %s294_s25, 3 }
  0xb1   : > { %s296_s7 = scalar_lea.hbm %s744_s2, %s355_s28 }
  0xb2   : > { %s297_s8 = scalar_lea.hbm %s296_s7, 8 }
  0xb3   : > { %s242_s24 = sshll.u32 %s297_s8, 4  ;;  %s243_s24 = int_to_ptr.hbm [resolvable:$true] %s242_s24 }
  0xb4   : > { %s484_s17 = sshra.s32 %s243_s24, 4  ;;  %s485_s17 = int_to_ptr.hbm [resolvable:$true] %s484_s17 }
  0xb5   : > { %s486_s18 = scalar_lea.hbm %s485_s17, 8  ;;  %p491_p11 = scmp.lt.s32.totalorder %s485_s17, %s744_s2 }
  0xb6   : > { %p487_p7 = scmp.ne.s32.totalorder %s485_s17, %s486_s18  ;;  %p492_p13 = scmp.lt.s32.totalorder %s490_s19, %s486_s18 }
  0xb8   : > { %p488_p8 = pnand %p487_p7, %p660_p10  ;;  %p493_p0 = por %p492_p13, %p491_p11 }
  0xba   : > { %p489_p9 = pneg %p488_p8 }
  0xbc   : > { %p494_p1 = pnand %p493_p0, %p489_p9 }
  0xbe   : > { %497 = shalt.err (!%p494_p1)
}
  0xbf   : > { %360 = dma.vmem_to_hbm [thread:$0]  (%p660_p10), %s241_s27, 128, %s243_s24, %s225_s4  }
  0xc0 PF: > { %p371_p2 = scmp.ge.s32.totalorder %s568_s16, 2  ;;  %s254_s5 = sand.u32 1, %s540_s9  }
  0xc1   : > { %s255_s25 = scalar_lea.sflag [#allocation4], %s254_s5 }
  0xc2   : > { %p367_p4 = pnand %p371_p2, %p664_p12 }
  0xc4   : > { %p368_p3 = pneg %p367_p4 }
  0xc6   : > { %535 = dma.done.wait (%p368_p3), %s255_s25, 128  }
  0xc7   : > { %537 = vsyncadd (%p368_p3), %s255_s25, 4294967168  ;;  %s18_s16 = sadd.s32 1, %s568_s16   ;;  %s749_s9 = smov %s544_s10 }
  0xc8   : > { %p15_p5 = scmp.ge.s32.totalorder %s18_s16, 6   ;;  %s750_s10 = smov %s548_s11 }
  0xc9   : > { %s751_s11 = smov %s670_s3  ;;  %s752_s12 = smov %s560_s14 }
  0xca   : > { %s753_s13 = smov %s564_s15  ;;  %s754_s14 = smov %s636_s22 }
  0xcb   : > { %s755_s15 = smov %s759_s20  ;;  %17 = sbr.rel (!%p15_p5) target bundleno = 7 (0x7), region = 84 }
  0xd0   :  { %261 = vsyncpa [#allocation3], 1 }
  0xd1   :  { %263 = vsyncpa [#allocation3 + $0x1], 1 }
  0xd2   :  { %264 = vsyncpa [#allocation4], 1 }
  0xd3   :  { %266 = vsyncpa [#allocation4 + $0x1], 1 }

</bundles_post_ra>
